<compile_context>
chip_gen: v7x
topology: tpu7x:2x2x1
jax: 0.10.0
libtpu: 0.0.40
codegen_flags: <defaults>
</compile_context>

<pallas_src>
import functools

import jax
import jax.numpy as jnp
from jax.experimental import pallas as pl
from jax.experimental.pallas import tpu as pltpu

VMEM_LIMIT_BYTES = 32 * 1024 * 1024     # > v5e's 16 MiB default, safe on v6e/v7x
TARGET_BLOCK_BYTES = 4 * 1024 * 1024    # per-block target -> ~16 MiB double-buffered in+out
FUSED_LIMIT_BYTES = 4 * 1024 * 1024     # single-pass BN when whole packed array fits in VMEM
MAX_TILE_ROWS = 1024
NUM_STATS_SHARDS = 2                    # megacore split of the BN stats reduction (v7x: 2 TCs)

# TODO(synk): BatchNorm1d running_mean/running_var buffers are not updated
# (training-mode forward only); inference-mode stats have no equivalent here.


# ------------------------------ helpers ------------------------------------ #

def _choose_tile_rows(n_rows, width, itemsize=4):
    """Largest multiple-of-8 row tile that keeps a block near TARGET_BLOCK_BYTES."""
    rows = TARGET_BLOCK_BYTES // max(1, width * itemsize)
    rows = max(8, min(MAX_TILE_ROWS, rows))
    rows = (rows // 8) * 8
    n_rounded = ((n_rows + 7) // 8) * 8
    return max(8, min(rows, n_rounded))


def _pad_rows(x2d, multiple):
    n = x2d.shape[0]
    pad = (-n) % multiple
    if pad:
        x2d = jnp.pad(x2d, ((0, pad), (0, 0)))
    return x2d


# ----------------------------- BatchNorm1d path ----------------------------- #

def bn_fused_kernel(x_ref, gamma_ref, beta_ref, o_ref, *, n_true, eps, k, e):
    """Whole packed (Np, k*E) array resident in VMEM: stats + normalize in one pass."""
    x = x_ref[...].astype(jnp.float32)
    s0 = jnp.sum(x, axis=0, keepdims=True)         # (1, k*E) per-lane sums
    ss0 = jnp.sum(x * x, axis=0, keepdims=True)
    s, ss = s0, ss0
    # Cyclic-roll fold over the k lane groups: afterwards lane j holds the full
    # per-feature sum for feature (j % e), already broadcast to all k groups.
    for g in range(1, k):
        s = s + pltpu.roll(s0, shift=g * e, axis=1)
        ss = ss + pltpu.roll(ss0, shift=g * e, axis=1)
    inv_n = 1.0 / n_true
    mean = s * inv_n
    var = ss * inv_n - mean * mean                 # biased variance (PyTorch BN)
    scale = gamma_ref[...] * jax.lax.rsqrt(var + eps)
    shift = beta_ref[...] - mean * scale
    o_ref[...] = (x * scale + shift).astype(o_ref.dtype)


def bn_stats_kernel(x_ref, stats_ref):
    """Accumulate per-lane sum (row 0) / sum-of-squares (row 1) into this
    shard's (8, k*E) accumulator block (rows 2..7 stay zero)."""
    @pl.when(pl.program_id(1) == 0)
    def _():
        stats_ref[...] = jnp.zeros_like(stats_ref)

    x = x_ref[...].astype(jnp.float32)
    stats_ref[0:1, :] += jnp.sum(x, axis=0, keepdims=True)
    stats_ref[1:2, :] += jnp.sum(x * x, axis=0, keepdims=True)


def bn_scale_shift_kernel(x_ref, scale_ref, shift_ref, o_ref):
    o_ref[...] = (x_ref[...].astype(jnp.float32) * scale_ref[...]
                  + shift_ref[...]).astype(o_ref.dtype)


def batch_norm_1d(xf, gamma, beta, *, eps=1e-5, fused_limit_bytes=FUSED_LIMIT_BYTES):
    """xf: (N, E). Training-mode BatchNorm1d over axis 0 with affine."""
    N, E = xf.shape
    gamma = gamma.reshape(-1).astype(jnp.float32)
    beta = beta.reshape(-1).astype(jnp.float32)

    # Lane-dense packing: fold k consecutive rows into one 128-wide packed row.
    k = 128 // E if (E < 128 and 128 % E == 0) else 1
    Ep = k * E
    xp = _pad_rows(xf, k).reshape(-1, Ep) if k > 1 else xf
    gamma_t = jnp.tile(gamma.reshape(1, E), (1, k))
    beta_t = jnp.tile(beta.reshape(1, E), (1, k))

    if xp.shape[0] * Ep * xp.dtype.itemsize <= fused_limit_bytes:
        # Fast path: single fused kernel, one HBM read + one write.
        out_p = pl.pallas_call(
            functools.partial(bn_fused_kernel, n_true=float(N), eps=eps, k=k, e=E),
            out_shape=jax.ShapeDtypeStruct(xp.shape, xf.dtype),
            compiler_params=pltpu.CompilerParams(vmem_limit_bytes=VMEM_LIMIT_BYTES),
        )(xp, gamma_t, beta_t)
    else:
        tile_rows = _choose_tile_rows(xp.shape[0], Ep, xp.dtype.itemsize)
        xp = _pad_rows(xp, NUM_STATS_SHARDS * tile_rows)  # zero rows: sums unaffected
        Np = xp.shape[0]
        bpc = Np // (NUM_STATS_SHARDS * tile_rows)        # blocks per shard

        # Pass 1: sharded per-lane sum / sum-of-squares reduction.
        partials = pl.pallas_call(
            bn_stats_kernel,
            out_shape=jax.ShapeDtypeStruct((8 * NUM_STATS_SHARDS, Ep), jnp.float32),
            grid_spec=pltpu.PrefetchScalarGridSpec(
                num_scalar_prefetch=0,
                grid=(NUM_STATS_SHARDS, bpc),
                in_specs=[pl.BlockSpec((tile_rows, Ep),
                                       lambda c, i: (c * bpc + i, 0))],
                out_specs=pl.BlockSpec((8, Ep), lambda c, i: (c, 0)),
            ),
            compiler_params=pltpu.CompilerParams(
                dimension_semantics=("parallel", "arbitrary"),
                vmem_limit_bytes=VMEM_LIMIT_BYTES),
        )(xp)

        # Tiny finalize (plain jnp): fold shards + lane groups, then fold stats
        # into per-feature scale/shift so pass 2 is just x*scale + shift.
        s = sum(partials[8 * c] for c in range(NUM_STATS_SHARDS)).reshape(k, E).sum(axis=0)
        ss = sum(partials[8 * c + 1] for c in range(NUM_STATS_SHARDS)).reshape(k, E).sum(axis=0)
        mean = s / N
        var = ss / N - mean * mean                  # biased variance (PyTorch BN)
        scale = gamma * jax.lax.rsqrt(var + eps)
        shift = beta - mean * scale
        scale_t = jnp.tile(scale.reshape(1, E), (1, k))
        shift_t = jnp.tile(shift.reshape(1, E), (1, k))

        # Pass 2: normalize + affine as a single FMA per element.
        out_p = pl.pallas_call(
            bn_scale_shift_kernel,
            out_shape=jax.ShapeDtypeStruct((Np, Ep), xf.dtype),
            grid_spec=pltpu.PrefetchScalarGridSpec(
                num_scalar_prefetch=0,
                grid=(Np // tile_rows,),
                in_specs=[
                    pl.BlockSpec((tile_rows, Ep), lambda i: (i, 0)),
                    pl.BlockSpec((1, Ep), lambda i: (0, 0)),
                    pl.BlockSpec((1, Ep), lambda i: (0, 0)),
                ],
                out_specs=pl.BlockSpec((tile_rows, Ep), lambda i: (i, 0)),
            ),
            compiler_params=pltpu.CompilerParams(
                dimension_semantics=("parallel",),
                vmem_limit_bytes=VMEM_LIMIT_BYTES),
        )(xp, scale_t, shift_t)

    return out_p.reshape(-1, E)[:N]


# ------------------------------ LayerNorm path ------------------------------ #

def ln_kernel(x_ref, gamma_ref, beta_ref, o_ref, *, eps):
    x = x_ref[...].astype(jnp.float32)
    mean = jnp.mean(x, axis=-1, keepdims=True)
    xc = x - mean
    var = jnp.mean(xc * xc, axis=-1, keepdims=True)     # biased variance (PyTorch LN)
    o_ref[...] = (xc * jax.lax.rsqrt(var + eps) * gamma_ref[...]
                  + beta_ref[...]).astype(o_ref.dtype)


def layer_norm(xf, gamma, beta, *, eps=1e-5):
    N, E = xf.shape
    tile_rows = _choose_tile_rows(N, E, xf.dtype.itemsize)
    xp = _pad_rows(xf, tile_rows)
    Np = xp.shape[0]
    out = pl.pallas_call(
        functools.partial(ln_kernel, eps=eps),
        out_shape=jax.ShapeDtypeStruct((Np, E), xf.dtype),
        grid_spec=pltpu.PrefetchScalarGridSpec(
            num_scalar_prefetch=0,
            grid=(Np // tile_rows,),
            in_specs=[
                pl.BlockSpec((tile_rows, E), lambda i: (i, 0)),
                pl.BlockSpec((1, E), lambda i: (0, 0)),
                pl.BlockSpec((1, E), lambda i: (0, 0)),
            ],
            out_specs=pl.BlockSpec((tile_rows, E), lambda i: (i, 0)),
        ),
        compiler_params=pltpu.CompilerParams(
            dimension_semantics=("parallel",),
            vmem_limit_bytes=VMEM_LIMIT_BYTES),
    )(xp, gamma.reshape(1, E).astype(jnp.float32),
      beta.reshape(1, E).astype(jnp.float32))
    return out[:N]


# --------------------------------- Wrapper ---------------------------------- #

def normalization_forward(x, gamma, beta, kind="batch", eps=1e-5, **kw):
    """Equivalent of Normalization.forward. x: (..., E)."""
    if kind not in ("batch", "layer"):
        return x
    E = x.shape[-1]
    xf = x.reshape(-1, E)
    if kind == "batch":
        out = batch_norm_1d(xf, gamma, beta, eps=eps, **kw)
    else:
        out = layer_norm(xf, gamma, beta, eps=eps)
    return out.reshape(x.shape)


if __name__ == "__main__":
    B, S, E = 2, 8, 32          # embed_dim = 32
    key = jax.random.PRNGKey(0)
    kx, kg, kb, kx2 = jax.random.split(key, 4)

    x = jax.random.normal(kx, (B, S, E), dtype=jnp.float32)
    gamma = 1.0 + 0.1 * jax.random.normal(kg, (1, E), dtype=jnp.float32)
    beta = 0.1 * jax.random.normal(kb, (1, E), dtype=jnp.float32)

    # plain-JAX references
    def bn_ref(x, g, b, eps=1e-5):
        e = x.shape[-1]
        xf = x.reshape(-1, e)
        m = xf.mean(axis=0, keepdims=True)
        v = ((xf - m) ** 2).mean(axis=0, keepdims=True)
        return ((xf - m) * jax.lax.rsqrt(v + eps) * g.reshape(1, e)
                + b.reshape(1, e)).reshape(x.shape)

    def ln_ref(x, g, b, eps=1e-5):
        e = x.shape[-1]
        m = x.mean(axis=-1, keepdims=True)
        v = ((x - m) ** 2).mean(axis=-1, keepdims=True)
        return (x - m) * jax.lax.rsqrt(v + eps) * g.reshape(e) + b.reshape(e)

    # 1) BatchNorm, fused single-pass path (lane-packed: E=32 -> k=4).
    out = jax.block_until_ready(normalization_forward(x, gamma, beta, kind="batch"))
    assert jnp.allclose(out, bn_ref(x, gamma, beta), atol=1e-5, rtol=1e-5), "BN fused mismatch"

    # 2) BatchNorm, two-pass (stats + scale/shift) path, forced for coverage.
    out2 = jax.block_until_ready(
        normalization_forward(x, gamma, beta, kind="batch", fused_limit_bytes=0))
    assert jnp.allclose(out2, bn_ref(x, gamma, beta), atol=1e-5, rtol=1e-5), "BN two-pass mismatch"

    # 3) LayerNorm path.
    out3 = jax.block_until_ready(normalization_forward(x, gamma, beta, kind="layer"))
    assert jnp.allclose(out3, ln_ref(x, gamma, beta), atol=1e-5, rtol=1e-5), "LN mismatch"

    # 4) BatchNorm with an E that cannot be lane-packed (k=1 path).
    E2 = 48
    x2 = jax.random.normal(kx2, (B, S, E2), dtype=jnp.float32)
    g2 = jnp.ones((1, E2), jnp.float32)
    b2 = jnp.zeros((1, E2), jnp.float32)
    out4 = jax.block_until_ready(normalization_forward(x2, g2, b2, kind="batch"))
    assert jnp.allclose(out4, bn_ref(x2, g2, b2), atol=1e-5, rtol=1e-5), "BN k=1 mismatch"

    print("KERNEL_OK")
</pallas_src>

<mosaic_0001>
module attributes {stable_mosaic.version = 11 : i64} {
  func.func @bn_fused_kernel(%arg0: memref<4x128xf32, #tpu.memory_space<vmem>>, %arg1: memref<1x128xf32, #tpu.memory_space<vmem>>, %arg2: memref<1x128xf32, #tpu.memory_space<vmem>>, %arg3: memref<4x128xf32, #tpu.memory_space<vmem>>) attributes {dimension_semantics = [], scalar_prefetch = 0 : i64, scratch_operands = 0 : i64, tpu.core_type = #tpu.core_type<tc>} {
    %c0 = arith.constant 0 : index
    %c0_0 = arith.constant 0 : index
    %0 = vector.load %arg0[%c0, %c0_0] : memref<4x128xf32, #tpu.memory_space<vmem>>, vector<4x128xf32>
    %cst = arith.constant dense<0.000000e+00> : vector<128xf32>
    %1 = vector.multi_reduction <add>, %0, %cst [0] : vector<4x128xf32> to vector<128xf32>
    %2 = vector.shape_cast %1 : vector<128xf32> to vector<1x128xf32>
    %3 = arith.mulf %0, %0 : vector<4x128xf32>
    %cst_1 = arith.constant dense<0.000000e+00> : vector<128xf32>
    %4 = vector.multi_reduction <add>, %3, %cst_1 [0] : vector<4x128xf32> to vector<128xf32>
    %5 = vector.shape_cast %4 : vector<128xf32> to vector<1x128xf32>
    %c32_i32 = arith.constant 32 : i32
    %6 = tpu.dynamic_rotate %2 by %c32_i32 dim 1 : vector<1x128xf32>, i32 -> vector<1x128xf32>
    %7 = arith.addf %2, %6 : vector<1x128xf32>
    %c32_i32_2 = arith.constant 32 : i32
    %8 = tpu.dynamic_rotate %5 by %c32_i32_2 dim 1 : vector<1x128xf32>, i32 -> vector<1x128xf32>
    %9 = arith.addf %5, %8 : vector<1x128xf32>
    %c64_i32 = arith.constant 64 : i32
    %10 = tpu.dynamic_rotate %2 by %c64_i32 dim 1 : vector<1x128xf32>, i32 -> vector<1x128xf32>
    %11 = arith.addf %7, %10 : vector<1x128xf32>
    %c64_i32_3 = arith.constant 64 : i32
    %12 = tpu.dynamic_rotate %5 by %c64_i32_3 dim 1 : vector<1x128xf32>, i32 -> vector<1x128xf32>
    %13 = arith.addf %9, %12 : vector<1x128xf32>
    %c96_i32 = arith.constant 96 : i32
    %14 = tpu.dynamic_rotate %2 by %c96_i32 dim 1 : vector<1x128xf32>, i32 -> vector<1x128xf32>
    %15 = arith.addf %11, %14 : vector<1x128xf32>
    %c96_i32_4 = arith.constant 96 : i32
    %16 = tpu.dynamic_rotate %5 by %c96_i32_4 dim 1 : vector<1x128xf32>, i32 -> vector<1x128xf32>
    %17 = arith.addf %13, %16 : vector<1x128xf32>
    %cst_5 = arith.constant 6.250000e-02 : f32
    %18 = vector.broadcast %cst_5 : f32 to vector<1x128xf32>
    %19 = arith.mulf %15, %18 : vector<1x128xf32>
    %cst_6 = arith.constant 6.250000e-02 : f32
    %20 = vector.broadcast %cst_6 : f32 to vector<1x128xf32>
    %21 = arith.mulf %17, %20 : vector<1x128xf32>
    %22 = arith.mulf %19, %19 : vector<1x128xf32>
    %23 = arith.subf %21, %22 : vector<1x128xf32>
    %c0_7 = arith.constant 0 : index
    %c0_8 = arith.constant 0 : index
    %24 = vector.load %arg1[%c0_7, %c0_8] : memref<1x128xf32, #tpu.memory_space<vmem>>, vector<1x128xf32>
    %cst_9 = arith.constant 9.99999974E-6 : f32
    %25 = vector.broadcast %cst_9 : f32 to vector<1x128xf32>
    %26 = arith.addf %23, %25 : vector<1x128xf32>
    %27 = math.rsqrt %26 : vector<1x128xf32>
    %28 = arith.mulf %24, %27 : vector<1x128xf32>
    %c0_10 = arith.constant 0 : index
    %c0_11 = arith.constant 0 : index
    %29 = vector.load %arg2[%c0_10, %c0_11] : memref<1x128xf32, #tpu.memory_space<vmem>>, vector<1x128xf32>
    %30 = arith.mulf %19, %28 : vector<1x128xf32>
    %31 = arith.subf %29, %30 : vector<1x128xf32>
    %32 = vector.broadcast %28 : vector<1x128xf32> to vector<4x128xf32>
    %33 = arith.mulf %0, %32 : vector<4x128xf32>
    %34 = vector.broadcast %31 : vector<1x128xf32> to vector<4x128xf32>
    %35 = arith.addf %33, %34 : vector<4x128xf32>
    %c0_12 = arith.constant 0 : index
    %c0_13 = arith.constant 0 : index
    %36 = vector.load %arg3[%c0_12, %c0_13] : memref<4x128xf32, #tpu.memory_space<vmem>>, vector<4x128xf32>
    tpu.vector_store %arg3[%c0_12, %c0_13], %35 {strides = array<i32>} : memref<4x128xf32, #tpu.memory_space<vmem>>, vector<4x128xf32>,
    return
  }
}

</mosaic_0001>

<bundles_post_ra>
// kernel: tpu_custom_call.1
= control target key start
LH: loop header
LB: loop body
LE: loop exit
PB: predicated region body
PF: predicated region fallthrough
CT: control target
= control target key end

     0   :  { %8 = vsyncpa [#allocation3], 0  ;;  %s213_s0 = inlined_call_operand.hbm [shape: f32[4,128], index: 0, kind: input, shape index: {}]   ;;  %s214_s1 = inlined_call_operand.vmem [shape: f32[1,128], index: 1, kind: input, shape index: {}]   ;;  %s215_s2 = inlined_call_operand.vmem [shape: f32[1,128], index: 2, kind: input, shape index: {}]   ;;  %s216_s3 = inlined_call_operand.hbm [shape: f32[4,128], index: 3, kind: output, shape index: {}]  }
   0x1   :  { %9 = vsyncpa [#allocation4], 0  ;;  %s158_s12 = smov [#allocation2]   ;;  %s110_s16 = scalar_lea.hbm %s213_s0, 64 }
   0x2   :  { %s16_s13 = sshll.u32 %s158_s12, 4  ;;  %p111_p0 = scmp.ne.s32.totalorder %s213_s0, %s110_s16  ;;  %s17_s13 = int_to_ptr.vmem [resolvable:$true] %s16_s13 }
   0x3   :  { %p114_p1 = scmp.lt.u32.totalorder %s110_s16, %s213_s0 }
   0x5   :  { %p116_p2 = pnand %p114_p1, %p111_p0 }
   0x7   :  { %119 = shalt.err (!%p116_p2)
}
   0x8   :  { %s120_s21 = scalar_lea.vmem %s17_s13, 64  ;;  %p125_p4 = scmp.lt.s32.totalorder %s17_s13, %s17_s13 }
   0x9   :  { %p121_p3 = scmp.ne.s32.totalorder %s17_s13, %s120_s21  ;;  %p126_p5 = scmp.lt.s32.totalorder %s120_s21, %s120_s21 }
   0xb   :  { %p127_p6 = por %p126_p5, %p125_p4 }
   0xd   :  { %p128_p7 = pnand %p127_p6, %p121_p3 }
   0xf   :  { %131 = shalt.err (!%p128_p7)
}
  0x10   :  { %19 = dma.hbm_to_vmem [thread:$0]  %s213_s0, 64, %s17_s13, [#allocation3]  }
  0x11   :  { %154 = dma.done.wait [#allocation3], 64  }
  0x12   :  { %155 = vsyncadd [#allocation3], 4294967232  ;;  %vm28_vm0 = vcmask 1043456   ;;  %v27_v0 = vld [vmem:[#allocation2] sm:$0xf]  ;;  %s159_s24 = smov 64   ;;  %v74_v33 = vlaneseq }
  0x13   :  { %v29_v1 = vsel %vm28_vm0, %v27_v0, 0.0  ;;  %v36_v2 = vmul.f32 %v27_v0, %v27_v0  ;;  %s160_s0 = smov 32   ;;  %s161_s25 = smov 96   ;;  %v66_v35 = vld [vmem:[%s214_s1] sm:$0x1] }
  0x14   :  { %v30_v3 = vrot.slane %v29_v1, 4  ;;  %v75_v34 = vshrl.u32 %v74_v33, 7  ;;  %v70_v39 = vld [vmem:[%s215_s2] sm:$0x1]  ;;  %s162_s30 = smov [#allocation5]  }
  0x15   :  { %v37_v4 = vsel %vm28_vm0, %v36_v2, 0.0  ;;  %s94_s4 = sshll.u32 %s162_s30, 4  ;;  %s95_s4 = int_to_ptr.vmem [resolvable:$true] %s94_s4 }
  0x16   :  { %v31_v5 = vadd.f32 %v30_v3, %v29_v1  ;;  %v38_v6 = vrot.slane %v37_v4, 4  ;;  %v76_v36 = vsub.s32 0, %v75_v34  ;;  %s132_s5 = scalar_lea.vmem %s95_s4, 64  ;;  %p137_p9 = scmp.lt.s32.totalorder %s95_s4, %s95_s4 }
  0x17   :  { %p133_p8 = scmp.ne.s32.totalorder %s95_s4, %s132_s5  ;;  %p138_p10 = scmp.lt.s32.totalorder %s132_s5, %s132_s5 }
  0x18   :  { %v32_v7 = vrot.slane %v31_v5, 2  ;;  %v39_v8 = vadd.f32 %v38_v6, %v37_v4 }
  0x19   :  { %p139_p11 = por %p138_p10, %p137_p9 }
  0x1a   :  { %v33_v9 = vadd.f32 %v32_v7, %v31_v5  ;;  %v40_v10 = vrot.slane %v39_v8, 2 }
  0x1b   :  { %p140_p12 = pnand %p139_p11, %p133_p8 }
  0x1c   :  { %v34_v11 = vrot.slane %v33_v9, 1  ;;  %v41_v12 = vadd.f32 %v40_v10, %v39_v8 }
  0x1e   :  { %v35_v13 = vadd.f32 %v34_v11, %v33_v9  ;;  %v42_v14 = vrot.slane %v41_v12, 1 }
  0x20   :  { %50 = vrot.lane.b32.xlu1 %v35_v13, %s159_s24  ;;  %44 = vrot.lane.b32.xlu0 %v35_v13, %s160_s0  ;;  %v43_v15 = vadd.f32 %v42_v14, %v41_v12 }
  0x24   :  { %53 = vrot.lane.b32.xlu1 %v43_v15, %s159_s24  ;;  %47 = vrot.lane.b32.xlu0 %v43_v15, %s160_s0 }
  0x28   :  { %59 = vrot.lane.b32.xlu1 %v43_v15, %s161_s25  ;;  %56 = vrot.lane.b32.xlu0 %v35_v13, %s161_s25 }
  0x92   :  { %v51_v16 = vpop.permute.xlu1 %50  ;;  %v45_v17 = vpop.permute.xlu0 %44 }
  0x93   :  { %v46_v18 = vadd.f32 %v45_v17, %v35_v13 }
  0x95   :  { %v52_v23 = vadd.f32 %v51_v16, %v46_v18 }
  0x96   :  { %v54_v19 = vpop.permute.xlu1 %53  ;;  %v48_v20 = vpop.permute.xlu0 %47 }
  0x97   :  { %v49_v21 = vadd.f32 %v48_v20, %v43_v15 }
  0x99   :  { %v55_v22 = vadd.f32 %v54_v19, %v49_v21 }
  0x9a   :  { %v60_v24 = vpop.permute.xlu1 %59  ;;  %v57_v25 = vpop.permute.xlu0 %56 }
  0x9b   :  { %v61_v26 = vadd.f32 %v60_v24, %v55_v22  ;;  %v58_v27 = vadd.f32 %v57_v25, %v52_v23 }
  0x9d   :  { %v62_v28 = vmul.f32 0.0625, %v58_v27  ;;  %v63_v29 = vmul.f32 0.0625, %v61_v26 }
  0x9f   :  { %v64_v30 = vmul.f32 %v62_v28, %v62_v28 }
  0xa1   :  { %v65_v31 = vsub.f32 %v63_v29, %v64_v30 }
  0xa3   :  { %v67_v32 = vadd.f32 1e-05, %v65_v31 }
  0xa5   :  { %108 = vrsqrt.f32 %v67_v32 }
  0xaf   :  { %v109_v37 = vpop.eup %108 }
  0xb0   :  { %v69_v38 = vmul.f32 %v109_v37, %v66_v35 }
  0xb2   :  { %v71_v40 = vmul.f32 %v69_v38, %v62_v28  ;;  %v77_v41 = vrot.slane %v69_v38, %v76_v36 }
  0xb4   :  { %v72_v42 = vsub.f32 %v70_v39, %v71_v40  ;;  %v79_v43 = vmul.f32 %v77_v41, %v27_v0 }
  0xb6   :  { %v84_v44 = vrot.slane %v72_v42, %v76_v36 }
  0xb8   :  { %v86_v45 = vadd.f32 %v84_v44, %v79_v43 }
  0xba   :  { %87 = vst [vmem:[#allocation5] sm:$0xf] %v86_v45 }
  0xbb   :  { %143 = shalt.err (!%p140_p12)
}
  0xbc   :  { %s144_s2 = scalar_lea.hbm %s216_s3, 64 }
  0xbd   :  { %p145_p13 = scmp.ne.s32.totalorder %s216_s3, %s144_s2  ;;  %p148_p0 = scmp.lt.u32.totalorder %s144_s2, %s216_s3 }
  0xbf   :  { %p150_p1 = pnand %p148_p0, %p145_p13 }
  0xc1   :  { %153 = shalt.err (!%p150_p1)
}
  0xc2   :  { %97 = dma.vmem_to_hbm [thread:$0]  %s95_s4, 64, %s216_s3, [#allocation4]  }
  0xc3   :  { %156 = dma.done.wait [#allocation4], 64  }
  0xc4   :  { %157 = vsyncadd [#allocation4], 4294967232 }
  0xc5   :  { %101 = vsyncpa [#allocation3], 1 }
  0xc6   :  { %102 = vsyncpa [#allocation4], 1 }

</bundles_post_ra>
